<compile_context>
chip_gen: v7x
topology: tpu7x:2x2x1
jax: 0.10.0
libtpu: 0.0.40
codegen_flags: <defaults>
</compile_context>

<pallas_src>
import functools

import jax
import jax.numpy as jnp
from jax.experimental import pallas as pl
from jax.experimental.pallas import tpu as pltpu

_EPS = 1e-5
_LANE = 128


def _round_up(n, m=_LANE):
    return ((n + m - 1) // m) * m


def _pad_axis(a, target, axis):
    pad = target - a.shape[axis]
    if pad == 0:
        return a
    widths = [(0, 0)] * a.ndim
    widths[axis] = (0, pad)
    return jnp.pad(a, widths)


def _cparams(vmem_need_bytes):
    return pltpu.CompilerParams(
        dimension_semantics=("parallel",),
        vmem_limit_bytes=int(min(96 << 20, max(32 << 20, vmem_need_bytes))))


def _cost(flops, bytes_accessed, transcendentals=0):
    return pl.CostEstimate(flops=int(flops), transcendentals=int(transcendentals),
                           bytes_accessed=int(bytes_accessed))


# ---------------------------------------------------------------------------
# Kernels (one image tile per grid step)
# ---------------------------------------------------------------------------

def _conv1x1_stats_kernel(x_ref, w_ref, h_ref, st_ref):
    """h = x @ w ; emit per-tile (sum, sumsq) of h for the following BN."""
    f32 = jnp.float32
    h = jnp.dot(x_ref[...].astype(jnp.bfloat16), w_ref[...],
                preferred_element_type=f32)
    h_ref[...] = h.astype(h_ref.dtype)
    st_ref[0, 0:1, :] = jnp.sum(h, axis=0, keepdims=True)
    st_ref[0, 1:2, :] = jnp.sum(h * h, axis=0, keepdims=True)


def _affine_relu_conv1x1_stats_kernel(hin_ref, s_ref, t_ref, w_ref, h_ref, st_ref):
    """h = relu(hin*s + t) @ w ; emit per-tile (sum, sumsq) of h."""
    f32 = jnp.float32
    a = jnp.maximum(hin_ref[...].astype(f32) * s_ref[...] + t_ref[...], 0.0)
    h = jnp.dot(a.astype(jnp.bfloat16), w_ref[...], preferred_element_type=f32)
    h_ref[...] = h.astype(h_ref.dtype)
    st_ref[0, 0:1, :] = jnp.sum(h, axis=0, keepdims=True)
    st_ref[0, 1:2, :] = jnp.sum(h * h, axis=0, keepdims=True)


def _affine_relu_conv3x3_stats_kernel(hin_ref, s_ref, t_ref, w_ref, h_ref, st_ref,
                                      *, H, W):
    """a = relu(hin*s + t); h = conv3x3(a) as 9 accumulated per-tap matmuls."""
    f32 = jnp.float32
    bf16 = jnp.bfloat16
    HW = hin_ref.shape[0]
    C2p = w_ref.shape[2]

    a = jnp.maximum(hin_ref[...].astype(f32) * s_ref[...] + t_ref[...], 0.0)

    r = jax.lax.broadcasted_iota(jnp.int32, (HW, 1), 0)     # hoisted out of loop
    yy = r // W
    xx = r - yy * W

    acc = jnp.zeros((HW, C2p), f32)
    tap = 0
    for dy in (-1, 0, 1):
        for dx in (-1, 0, 1):
            shift = dy * W + dx
            if shift == 0:
                src = a
            else:
                # rolled[i] == a[(i + shift) % HW]; rows whose source pixel
                # falls outside the image are zeroed (f32 VPU work) before the
                # bf16 cast.  Each masked tap is consumed immediately by the
                # MXU -- no im2col buffer is materialized.
                rolled = pltpu.roll(a, shift=(-shift) % HW, axis=0)
                valid = ((yy + dy >= 0) & (yy + dy < H) &
                         (xx + dx >= 0) & (xx + dx < W)).astype(f32)
                src = rolled * valid
            acc = acc + jnp.dot(src.astype(bf16), w_ref[tap],
                                preferred_element_type=f32)
            tap += 1

    h_ref[...] = acc.astype(h_ref.dtype)
    st_ref[0, 0:1, :] = jnp.sum(acc, axis=0, keepdims=True)
    st_ref[0, 1:2, :] = jnp.sum(acc * acc, axis=0, keepdims=True)


def _bn_residual_relu_kernel(h_ref, x_ref, s_ref, t_ref, o_ref):
    """out = relu(h*s + t + x)   (downsample=None residual path)."""
    h = h_ref[...].astype(jnp.float32)
    o_ref[...] = jnp.maximum(h * s_ref[...] + t_ref[...] + x_ref[...], 0.0)


# ---------------------------------------------------------------------------
# Host-side glue
# ---------------------------------------------------------------------------

def _fold_bn(stats, gamma, beta, count):
    """Fold per-tile (sum, sumsq) into a single affine: y_norm = y*scale + shift."""
    tot = jnp.sum(stats, axis=0)                       # (2, Cp)
    mean = tot[0] / count
    var = tot[1] / count - mean * mean                 # biased (training-mode) BN
    # TODO(synk): E[y^2]-E[y]^2 cancels when |mean| >> std; a shifted-moment or
    # two-pass stats kernel would be more robust for such distributions.
    scale = gamma * jax.lax.rsqrt(var + _EPS)
    shift = beta - mean * scale
    return scale.reshape(1, -1), shift.reshape(1, -1)


def pack_params(params):
    """One-time packing: PyTorch OIHW weights -> lane-dense bf16 matmul layouts."""
    C1, C0 = params["w1"].shape[:2]
    C2 = params["w2"].shape[0]
    C3 = params["w3"].shape[0]
    C0p, C1p, C2p, C3p = map(_round_up, (C0, C1, C2, C3))

    w1 = _pad_axis(_pad_axis(params["w1"][:, :, 0, 0].T, C0p, 0), C1p, 1)
    w2 = jnp.transpose(params["w2"], (2, 3, 1, 0))                  # (3,3,C1,C2)
    w2 = _pad_axis(_pad_axis(w2, C1p, 2), C2p, 3).reshape(9, C1p, C2p)
    w3 = _pad_axis(_pad_axis(params["w3"][:, :, 0, 0].T, C2p, 0), C3p, 1)

    def vec(v, cp):
        return _pad_axis(v.astype(jnp.float32), cp, 0)

    return {
        "dims": (C0, C1, C2, C3, C0p, C1p, C2p, C3p),
        "w1": w1.astype(jnp.bfloat16),
        "w2": w2.astype(jnp.bfloat16),
        "w3": w3.astype(jnp.bfloat16),
        "g1": vec(params["g1"], C1p), "b1": vec(params["b1"], C1p),
        "g2": vec(params["g2"], C2p), "b2": vec(params["b2"], C2p),
        "g3": vec(params["g3"], C3p), "b3": vec(params["b3"], C3p),
    }


def bottleneck_forward(x_nchw, packed):
    """Bottleneck forward (stride=1, downsample=None) via 4 tiled Pallas kernels."""
    N, C0, H, W = x_nchw.shape
    C0_, C1, C2, C3, C0p, C1p, C2p, C3p = packed["dims"]
    assert C0 == C0_, "input channels do not match packed weights"
    assert C0 == C3, "residual add (downsample=None) needs inplanes == planes*4"
    HW = H * W
    M = N * HW
    assert HW % 8 == 0, "H*W must be a multiple of 8 (sublane tiling)"
    # TODO(synk): for very large H*W, use sub-image M-tiles with a +/-W-row halo
    # instead of one image per grid step to bound per-step VMEM further.

    f32, bf16 = jnp.float32, jnp.bfloat16

    # NCHW -> flattened channels-last, zero-padded to lane-dense channel width.
    x2d = _pad_axis(jnp.transpose(x_nchw, (0, 2, 3, 1)).reshape(M, C0), C0p, 1)

    row_spec = lambda cp: pl.BlockSpec((HW, cp), lambda n: (n, 0))
    full2 = lambda shape: pl.BlockSpec(shape, lambda n: (0, 0))
    full3 = lambda shape: pl.BlockSpec(shape, lambda n: (0, 0, 0))
    stat_spec = lambda cp: pl.BlockSpec((1, 2, cp), lambda n: (n, 0, 0))

    # ---- stage 1: conv1 (1x1) + BN1 partial stats ---------------------------
    h1, st1 = pl.pallas_call(
        _conv1x1_stats_kernel,
        out_shape=(jax.ShapeDtypeStruct((M, C1p), bf16),
                   jax.ShapeDtypeStruct((N, 2, C1p), f32)),
        grid=(N,),
        in_specs=[row_spec(C0p), full2((C0p, C1p))],
        out_specs=(row_spec(C1p), stat_spec(C1p)),
        compiler_params=_cparams(2 * HW * (4 * C0p + 2 * C1p)
                                 + 4 * C0p * C1p + 8 * HW * C1p + (4 << 20)),
        cost_estimate=_cost(2 * M * C0p * C1p + 4 * M * C1p,
                            4 * M * C0p + 2 * C0p * C1p + 2 * M * C1p),
    )(x2d, packed["w1"])
    s1, t1 = _fold_bn(st1, packed["g1"], packed["b1"], M)

    # ---- stage 2: BN1 + relu + conv2 (3x3, pad=1) + BN2 partial stats -------
    h2, st2 = pl.pallas_call(
        functools.partial(_affine_relu_conv3x3_stats_kernel, H=H, W=W),
        out_shape=(jax.ShapeDtypeStruct((M, C2p), bf16),
                   jax.ShapeDtypeStruct((N, 2, C2p), f32)),
        grid=(N,),
        in_specs=[row_spec(C1p), full2((1, C1p)), full2((1, C1p)),
                  full3((9, C1p, C2p))],
        out_specs=(row_spec(C2p), stat_spec(C2p)),
        compiler_params=_cparams(2 * (2 * HW * C1p + 18 * C1p * C2p + 2 * HW * C2p)
                                 + 4 * HW * (3 * C1p + 2 * C2p) + (4 << 20)),
        cost_estimate=_cost(18 * M * C1p * C2p + 10 * M * C1p + 4 * M * C2p,
                            2 * M * C1p + 18 * C1p * C2p + 2 * M * C2p),
    )(h1, s1, t1, packed["w2"])
    s2, t2 = _fold_bn(st2, packed["g2"], packed["b2"], M)

    # ---- stage 3: BN2 + relu + conv3 (1x1) + BN3 partial stats --------------
    h3, st3 = pl.pallas_call(
        _affine_relu_conv1x1_stats_kernel,
        out_shape=(jax.ShapeDtypeStruct((M, C3p), bf16),
                   jax.ShapeDtypeStruct((N, 2, C3p), f32)),
        grid=(N,),
        in_specs=[row_spec(C2p), full2((1, C2p)), full2((1, C2p)),
                  full2((C2p, C3p))],
        out_specs=(row_spec(C3p), stat_spec(C3p)),
        compiler_params=_cparams(2 * HW * (2 * C2p + 2 * C3p) + 4 * C2p * C3p
                                 + 4 * HW * (C2p + C3p) + (4 << 20)),
        cost_estimate=_cost(2 * M * C2p * C3p + 3 * M * C2p + 4 * M * C3p,
                            2 * M * C2p + 2 * C2p * C3p + 2 * M * C3p),
    )(h2, s2, t2, packed["w3"])
    s3, t3 = _fold_bn(st3, packed["g3"], packed["b3"], M)

    # ---- stage 4: BN3 + residual add + relu ---------------------------------
    out2d = pl.pallas_call(
        _bn_residual_relu_kernel,
        out_shape=jax.ShapeDtypeStruct((M, C3p), f32),
        grid=(N,),
        in_specs=[row_spec(C3p), row_spec(C0p), full2((1, C3p)), full2((1, C3p))],
        out_specs=row_spec(C3p),
        compiler_params=_cparams(2 * HW * (2 * C3p + 4 * C0p + 4 * C3p) + (4 << 20)),
        cost_estimate=_cost(4 * M * C3p, 2 * M * C3p + 4 * M * C0p + 4 * M * C3p),
    )(h3, x2d, s3, t3)

    # drop channel padding; flattened channels-last -> NCHW.
    return jnp.transpose(out2d[:, :C3].reshape(N, H, W, C3), (0, 3, 1, 2))


# ---------------------------------------------------------------------------
# Pure-JAX reference (training-mode BN) and example params
# ---------------------------------------------------------------------------

def bottleneck_reference(x, p):
    dn = ("NCHW", "OIHW", "NCHW")

    def bn(y, g, b):
        mu = y.mean(axis=(0, 2, 3), keepdims=True)
        var = ((y - mu) ** 2).mean(axis=(0, 2, 3), keepdims=True)
        return ((y - mu) / jnp.sqrt(var + _EPS)
                * g.reshape(1, -1, 1, 1) + b.reshape(1, -1, 1, 1))

    out = jax.lax.conv_general_dilated(x, p["w1"], (1, 1), "VALID",
                                       dimension_numbers=dn)
    out = jnp.maximum(bn(out, p["g1"], p["b1"]), 0.0)
    out = jax.lax.conv_general_dilated(out, p["w2"], (1, 1),
                                       ((1, 1), (1, 1)), dimension_numbers=dn)
    out = jnp.maximum(bn(out, p["g2"], p["b2"]), 0.0)
    out = jax.lax.conv_general_dilated(out, p["w3"], (1, 1), "VALID",
                                       dimension_numbers=dn)
    out = bn(out, p["g3"], p["b3"])
    return jnp.maximum(out + x, 0.0)


def make_params(key, inplanes, planes, cfg):
    c0, c1, c2 = cfg
    c3 = planes * 4
    ks = jax.random.split(key, 9)
    return {
        "w1": 0.2 * jax.random.normal(ks[0], (c1, c0, 1, 1), jnp.float32),
        "g1": 0.8 + 0.4 * jax.random.uniform(ks[1], (c1,), jnp.float32),
        "b1": 0.1 * jax.random.normal(ks[2], (c1,), jnp.float32),
        "w2": 0.2 * jax.random.normal(ks[3], (c2, c1, 3, 3), jnp.float32),
        "g2": 0.8 + 0.4 * jax.random.uniform(ks[4], (c2,), jnp.float32),
        "b2": 0.1 * jax.random.normal(ks[5], (c2,), jnp.float32),
        "w3": 0.2 * jax.random.normal(ks[6], (c3, c2, 1, 1), jnp.float32),
        "g3": 0.8 + 0.4 * jax.random.uniform(ks[7], (c3,), jnp.float32),
        "b3": 0.1 * jax.random.normal(ks[8], (c3,), jnp.float32),
    }


if __name__ == "__main__":
    # Bottleneck(inplanes=16, planes=4, cfg=[16, 8, 8]), stride=1,
    # downsample=None -> residual add requires inplanes == planes*4.
    key = jax.random.PRNGKey(0)
    k_x, k_p = jax.random.split(key)
    N, inplanes, H, W = 2, 16, 8, 8
    planes, cfg = 4, (16, 8, 8)

    x = jax.random.normal(k_x, (N, inplanes, H, W), jnp.float32)
    params = make_params(k_p, inplanes, planes, cfg)
    packed = pack_params(params)          # one-time weight packing (hoisted)

    out = jax.block_until_ready(bottleneck_forward(x, packed))
    ref = jax.block_until_ready(bottleneck_reference(x, params))

    # bf16 MXU operands / bf16 inter-stage activations with f32 accumulation
    # and f32 BN stats -> allow mixed-precision slack.
    max_err = float(jnp.max(jnp.abs(out - ref)))
    if max_err > 5e-2:
        raise AssertionError(f"Pallas output mismatch, max abs err = {max_err}")

    print("KERNEL_OK")
</pallas_src>

<mosaic_0001>
module attributes {stable_mosaic.version = 11 : i64} {
  func.func @_conv1x1_stats_kernel(%arg0: i32, %arg1: memref<64x128xf32, #tpu.memory_space<vmem>>, %arg2: memref<128x128xbf16, #tpu.memory_space<vmem>>, %arg3: memref<64x128xbf16, #tpu.memory_space<vmem>>, %arg4: memref<1x2x128xf32, #tpu.memory_space<vmem>>) attributes {dimension_semantics = [#tpu.dimension_semantics<parallel>], iteration_bounds = array<i64: 2>, scalar_prefetch = 0 : i64, scratch_operands = 0 : i64, tpu.core_type = #tpu.core_type<tc>, window_params = [{transform_indices = @transform_0, window_bounds = array<i64: 64, 128>}, {pipeline_mode = #tpu.pipeline_mode<synchronous>, transform_indices = @transform_1, window_bounds = array<i64: 128, 128>}, {transform_indices = @transform_2, window_bounds = array<i64: 64, 128>}, {transform_indices = @transform_3, window_bounds = array<i64: 1, 2, 128>}]} {
    %c0 = arith.constant 0 : index
    %c0_0 = arith.constant 0 : index
    %0 = vector.load %arg1[%c0, %c0_0] : memref<64x128xf32, #tpu.memory_space<vmem>>, vector<64x128xf32>
    %1 = arith.truncf %0 : vector<64x128xf32> to vector<64x128xbf16>
    %c0_1 = arith.constant 0 : index
    %c0_2 = arith.constant 0 : index
    %2 = vector.load %arg2[%c0_1, %c0_2] : memref<128x128xbf16, #tpu.memory_space<vmem>>, vector<128x128xbf16>
    %cst = arith.constant dense<0.000000e+00> : vector<64x128xf32>
    %3 = tpu.matmul %1, %2, %cst {dimension_numbers = #tpu.dot_dimension_numbers<[1], [0], [0], [1], [0, 0, 1, 1], [], []>} : vector<64x128xbf16>, vector<128x128xbf16>, vector<64x128xf32> -> vector<64x128xf32>
    %4 = arith.truncf %3 : vector<64x128xf32> to vector<64x128xbf16>
    %c0_3 = arith.constant 0 : index
    %c0_4 = arith.constant 0 : index
    %5 = vector.load %arg3[%c0_3, %c0_4] : memref<64x128xbf16, #tpu.memory_space<vmem>>, vector<64x128xbf16>
    tpu.vector_store %arg3[%c0_3, %c0_4], %4 {strides = array<i32>} : memref<64x128xbf16, #tpu.memory_space<vmem>>, vector<64x128xbf16>,
    %cst_5 = arith.constant dense<0.000000e+00> : vector<128xf32>
    %6 = vector.multi_reduction <add>, %3, %cst_5 [0] : vector<64x128xf32> to vector<128xf32>
    %7 = vector.shape_cast %6 : vector<128xf32> to vector<1x128xf32>
    %c0_6 = arith.constant 0 : index
    %c0_7 = arith.constant 0 : index
    %c0_8 = arith.constant 0 : index
    %8 = vector.load %arg4[%c0_6, %c0_7, %c0_8] : memref<1x2x128xf32, #tpu.memory_space<vmem>>, vector<1x1x128xf32>
    %9 = vector.shape_cast %8 : vector<1x1x128xf32> to vector<1x128xf32>
    %10 = vector.shape_cast %7 : vector<1x128xf32> to vector<1x1x128xf32>
    tpu.vector_store %arg4[%c0_6, %c0_7, %c0_8], %10 {strides = array<i32>} : memref<1x2x128xf32, #tpu.memory_space<vmem>>, vector<1x1x128xf32>,
    %11 = arith.mulf %3, %3 : vector<64x128xf32>
    %cst_9 = arith.constant dense<0.000000e+00> : vector<128xf32>
    %12 = vector.multi_reduction <add>, %11, %cst_9 [0] : vector<64x128xf32> to vector<128xf32>
    %13 = vector.shape_cast %12 : vector<128xf32> to vector<1x128xf32>
    %c0_10 = arith.constant 0 : index
    %c1 = arith.constant 1 : index
    %c0_11 = arith.constant 0 : index
    %14 = vector.load %arg4[%c0_10, %c1, %c0_11] : memref<1x2x128xf32, #tpu.memory_space<vmem>>, vector<1x1x128xf32>
    %15 = vector.shape_cast %14 : vector<1x1x128xf32> to vector<1x128xf32>
    %16 = vector.shape_cast %13 : vector<1x128xf32> to vector<1x1x128xf32>
    tpu.vector_store %arg4[%c0_10, %c1, %c0_11], %16 {strides = array<i32>} : memref<1x2x128xf32, #tpu.memory_space<vmem>>, vector<1x1x128xf32>,
    return
  }
  func.func @transform_0(%arg0: i32) -> (i32, i32) {
    %c0_i32 = arith.constant 0 : i32
    %c0_i32_0 = arith.constant 0 : i32
    return %arg0, %c0_i32 : i32, i32
  }
  func.func @transform_1(%arg0: i32) -> (i32, i32) {
    %c0_i32 = arith.constant 0 : i32
    %c0_i32_0 = arith.constant 0 : i32
    %c0_i32_1 = arith.constant 0 : i32
    return %c0_i32, %c0_i32_0 : i32, i32
  }
  func.func @transform_2(%arg0: i32) -> (i32, i32) {
    %c0_i32 = arith.constant 0 : i32
    %c0_i32_0 = arith.constant 0 : i32
    return %arg0, %c0_i32 : i32, i32
  }
  func.func @transform_3(%arg0: i32) -> (i32, i32, i32) {
    %c0_i32 = arith.constant 0 : i32
    %c0_i32_0 = arith.constant 0 : i32
    %c0_i32_1 = arith.constant 0 : i32
    return %arg0, %c0_i32, %c0_i32_0 : i32, i32, i32
  }
}

</mosaic_0001>

<bundles_post_ra>
// kernel: tpu_custom_call.1
= control target key start
LH: loop header
LB: loop body
LE: loop exit
PB: predicated region body
PF: predicated region fallthrough
CT: control target
= control target key end

     0   :  { %9 = vsyncpa [#allocation3], 0  ;;  %s1219_s0 = inlined_call_operand.hbm [shape: f32[128,128], index: 0, kind: input, shape index: {}]   ;;  %s1220_s1 = inlined_call_operand.hbm [shape: bf16[128,128], index: 1, kind: input, shape index: {}]   ;;  %s1221_s2 = inlined_call_operand.hbm [shape: bf16[128,128], index: 2, kind: output, shape index: {0}]   ;;  %s1222_s3 = inlined_call_operand.hbm [shape: f32[2,2,128], index: 3, kind: output, shape index: {1}]  }
   0x1   :  { %11 = vsyncpa [#allocation3 + $0x1], 0 }
   0x2   :  { %12 = vsyncpa [#allocation6], 0 }
   0x3   :  { %13 = vsyncpa [#allocation4], 0 }
   0x4   :  { %15 = vsyncpa [#allocation4 + $0x1], 0 }
   0x5   :  { %16 = vsyncpa [#allocation9], 0 }
   0x6   :  { %18 = vsyncpa [#allocation9 + $0x1], 0  ;;  %s970_s12 = smov 0   ;;  %s972_s13 = smov 0  }
   0x7   :  { %s974_s14 = smov 0   ;;  %s976_s15 = smov 0  }
   0x8 LB: > { %s991_s16 = sadd.s32 4294967295, %s938_s15   ;;  %s582_s17 = sadd.s32 4294967294, %s938_s15   ;;  %s938_s15 = sphi %s976_s15, %s1242_s15   ;;  %s934_s14 = sphi %s974_s14, %s1241_s14   ;;  %s930_s13 = sphi %s972_s13, %s1240_s13   ;;  %s926_s12 = sphi %s970_s12, %s1239_s12  }
   0x9   : > { %p44_p0 = scmp.ne.s32.totalorder %s930_s13, %s926_s12  ;;  %p1223_p1 = scmp.eq.s32.totalorder %s991_s16, 0 }
   0xa   : > { %p95_p3 = scmp.eq.s32.totalorder %s582_s17, 1  ;;  %p583_p5 = scmp.ge.s32.totalorder %s938_s15, 1 }
   0xb   : > { %p1000_p4 = por %p1223_p1, %p44_p0  ;;  %p128_p7 = scmp.lt.s32.totalorder %s938_s15, 3 }
   0xc   : > { %p1005_p6 = por %p95_p3, %p44_p0  ;;  %s940_s21 = smov [#allocation5]  }
   0xd   : > { %s1226_s18 = scalar_select %p1000_p4, 1, 0 }
   0xe   : > { %s1227_s19 = scalar_select %p1005_p6, 1, 0 }
   0xf   : > { %p1010_p8 = pnand %p583_p5, %p128_p7  ;;  %s140_s22 = sshll.u32 %s940_s21, 4  ;;  %s1014_s22 = int_to_ptr.vmem [resolvable:$true] %s140_s22 }
  0x10   : > { %s1026_s24 = sadd.s32 1, %s938_s15   ;;  %s31_s25 = sadd.s32 1, %s934_s14 }
  0x11   : > { %s1228_s20 = scalar_select %p1010_p8, 1, 0 }
  0x12   : > { %p712_p9 = pneg %p1010_p8  ;;  %s28_s26 = ssub.s32 %s938_s15, %s1026_s24 }
  0x13   : > { %s778_s29 = scalar_lea.hbm %s1220_s1, 1024 }
  0x14   : > { %p1021_p11 = pnand %p712_p9, %p1223_p1  ;;  %p779_p12 = scmp.ne.s32.totalorder %s1220_s1, %s778_s29 }
  0x15   : > { %p785_p5 = scmp.lt.u32.totalorder %s778_s29, %s1220_s1 }
  0x16   : > { %p780_p13 = pneg %p1021_p11 }
  0x18   : > { %p781_p0 = pnand %p780_p13, %p779_p12 }
  0x1a   : > { %p782_p3 = pneg %p781_p0 }
  0x1c   : > { %p787_p7 = pnand %p785_p5, %p782_p3 }
  0x1e   : > { %790 = shalt.err (!%p787_p7)
}
  0x1f   : > { %s791_s7 = scalar_lea.vmem %s1014_s22, 1024  ;;  %p799_p2 = scmp.lt.s32.totalorder %s1014_s22, %s1014_s22 }
  0x20   : > { %p792_p9 = scmp.ne.s32.totalorder %s1014_s22, %s791_s7  ;;  %p800_p6 = scmp.lt.s32.totalorder %s791_s7, %s791_s7 }
  0x22   : > { %p794_p10 = pnand %p792_p9, %p780_p13  ;;  %p801_p4 = por %p800_p6, %p799_p2 }
  0x24   : > { %p795_p1 = pneg %p794_p10 }
  0x26   : > { %p802_p8 = pnand %p801_p4, %p795_p1 }
  0x28   : > { %805 = shalt.err (!%p802_p8)
}
  0x29   : > { %s941_s8 = smov 64   ;;  %s942_s9 = smov 4  }
  0x2a   : > { %715 = dma.hbm_to_vmem [thread:$0]  (!%p1021_p11), %s1220_s1, 1024, %s1014_s22, [#allocation6], %s941_s8, %s941_s8, %s942_s9  }
  0x2b   : > { %p29_p2 = scmp.eq.s32.totalorder %s28_s26, 0  ;;  %p38_p1 = scmp.ne.s32.totalorder %s934_s14, %s930_s13 }
  0x2c   : > { %p39_p4 = scmp.eq.s32.totalorder %s938_s15, 0  ;;  %p728_p6 = scmp.lt.s32.totalorder %s938_s15, 2 }
  0x2d   : > { %s1057_s17 = scalar_select %p29_p2, %s934_s14, %s31_s25  }
  0x2e   : > { %p40_p8 = por %p39_p4, %p38_p1  ;;  %p1230_p10 = scmp.eq.s32.totalorder %s991_s16, 1 }
  0x2f   : > { %s154_s27 = sand.u32 1, %s934_s14   ;;  %s617_s28 = sshll.u32 %s938_s15, 10 }
  0x30   : > { %p1061_p12 = por %p1230_p10, %p38_p1  ;;  %s586_s29 = sshll.u32 %s154_s27, 6 }
  0x31   : > { %s1070_s4 = scalar_lea.hbm %s1219_s0, %s617_s28  ;;  %s158_s22 = scalar_lea.vmem [#allocation2], %s586_s29 }
  0x32   : > { %s165_s25 = sshll.u32 %s158_s22, 4  ;;  %p1072_p11 = pnand %p728_p6, %p40_p8  ;;  %s1076_s25 = int_to_ptr.vmem [resolvable:$true] %s165_s25 }
  0x33   : > { %s1078_s5 = scalar_lea.sflag [#allocation3], %s154_s27  ;;  %s806_s6 = scalar_lea.hbm %s1070_s4, 1024 }
  0x34   : > { %p807_p13 = scmp.ne.s32.totalorder %s1070_s4, %s806_s6  ;;  %p808_p0 = pneg %p1072_p11 }
  0x35   : > { %s811_s9 = scalar_lea.hbm %s1219_s0, 2048  ;;  %p812_p7 = scmp.lt.u32.totalorder %s1070_s4, %s1219_s0 }
  0x36   : > { %p809_p3 = pnand %p808_p0, %p807_p13  ;;  %p813_p9 = scmp.lt.u32.totalorder %s811_s9, %s806_s6 }
  0x37   : > { %p815_p1 = scmp.lt.u32.totalorder %s806_s6, %s1070_s4 }
  0x38   : > { %p810_p5 = pneg %p809_p3  ;;  %p814_p2 = por %p813_p9, %p812_p7 }
  0x3a   : > { %p816_p4 = por %p815_p1, %p814_p2 }
  0x3c   : > { %p817_p6 = pnand %p816_p4, %p810_p5 }
  0x3e   : > { %820 = shalt.err (!%p817_p6)
}
  0x3f   : > { %s821_s27 = scalar_lea.vmem %s1076_s25, 1024  ;;  %s943_s28 = smov [#allocation2]  }
  0x40   : > { %p822_p8 = scmp.ne.s32.totalorder %s1076_s25, %s821_s27  ;;  %s826_s29 = sshll.u32 %s943_s28, 4  ;;  %s827_s29 = int_to_ptr.vmem [resolvable:$false] %s826_s29 }
  0x41   : > { %s828_s23 = scalar_lea.vmem %s827_s29, 2048  ;;  %p829_p3 = scmp.lt.s32.totalorder %s1076_s25, %s827_s29 }
  0x42   : > { %p824_p10 = pnand %p822_p8, %p808_p0  ;;  %p830_p7 = scmp.lt.s32.totalorder %s828_s23, %s821_s27 }
  0x44   : > { %p825_p13 = pneg %p824_p10  ;;  %p831_p9 = por %p830_p7, %p829_p3 }
  0x46   : > { %p832_p2 = pnand %p831_p9, %p825_p13 }
  0x48   : > { %835 = shalt.err (!%p832_p2)
}
  0x49   : > { %s944_s30 = smov 128   ;;  %s945_s22 = smov 8  }
  0x4a   : > { %719 = dma.hbm_to_vmem [thread:$0]  (!%p1072_p11), %s1070_s4, 1024, %s1076_s25, %s1078_s5, %s944_s30, %s944_s30, %s945_s22  }
  0x4b   : > { %p1233_p0 = scmp.ne.s32.totalorder %s1228_s20, 0 }
  0x4c   : > { %s1109_s6 = sand.u32 (!%p1233_p0), 1, %s930_s13   ;;  %p1234_p5 = scmp.ne.s32.totalorder (!%p1233_p0), %s1226_s18, 0 }
  0x4d   : > { %177 = sbr.rel (%p1233_p0) target bundleno = 389 (0x185), region = 28  ;;  %s590_s7 = sshll.u32 (!%p1233_p0), %s1109_s6, 6 }
  0x4e   : > { %s180_s8 = scalar_lea.sflag (!%p1233_p0), [#allocation3], %s1109_s6  ;;  %s1113_s9 = scalar_lea.vmem (!%p1233_p0), [#allocation2], %s590_s7 }
  0x54   : > { %909 = dma.done.wait (%p1234_p5), %s180_s8, 1024  }
  0x55   : > { %911 = vsyncadd (%p1234_p5), %s180_s8, 4294966272  ;;  %p1235_p11 = scmp.eq.s32.totalorder %s991_s16, 0 }
  0x57   : > { %913 = dma.done.wait (%p1235_p11), [#allocation6], 1024   ;;  %p1236_p1 = pmov %p1235_p11 }
  0x58   : > { %v770_v0 = vld [vmem:[#allocation5] sm:$0xff]   ;;  %v771_v1 = vld [vmem:[#allocation5 + $0x8] sm:$0xff]   ;;  %v772_v2 = vld [vmem:[#allocation5 + $0x10] sm:$0xff]   ;;  %s592_s18 = sshll.u32 %s1109_s6, 5  ;;  %s626_s25 = sshll.u32 %s991_s16, 9 }
  0x59   : > { %915 = vsyncadd (%p1236_p1), [#allocation6], 4294966272  ;;  %662 = vmatprep.subr.bf16.mxu0 %v770_v0  ;;  %686 = vmatprep.subr.bf16.mxu1 %v770_v0  ;;  %v773_v3 = vld [vmem:[#allocation5 + $0x18] sm:$0xff]   ;;  %v218_v4 = vld [vmem:[%s1113_s9] sm:$0xff]  ;;  %s207_s20 = scalar_lea.vmem [#allocation7], %s592_s18  ;;  %s1141_s10 = scalar_lea.hbm %s1221_s2, %s626_s25 }
  0x5a   : > { %663 = vmatpush3.bf16.msra.mxu0 %v770_v0  ;;  %694 = vmatpush3.bf16.msra.mxu1 %v770_v0  ;;  %v219_v5 = vld [vmem:[%s1113_s9 + $0x8] sm:$0xff]  ;;  %v222_v7 = vld [vmem:[%s1113_s9 + $0x20] sm:$0xff]  ;;  %v776_v12 = vld [vmem:[#allocation5 + $0x30] sm:$0xff]   ;;  %s454_s4 = sshll.u32 %s207_s20, 4  ;;  %s436_s11 = scalar_lea.sflag [#allocation4], %s1109_s6  ;;  %s1135_s4 = int_to_ptr.vmem [resolvable:$true] %s454_s4 }
  0x5b   : > { %664 = vmatprep.subr.bf16.mxu0 %v771_v1  ;;  %687 = vmatprep.subr.bf16.mxu1 %v771_v1  ;;  %v226_v6 = vpack.c.bf16 %v219_v5, %v218_v4  ;;  %v223_v8 = vld [vmem:[%s1113_s9 + $0x28] sm:$0xff]  ;;  %v774_v10 = vld [vmem:[#allocation5 + $0x20] sm:$0xff]   ;;  %v777_v13 = vld [vmem:[#allocation5 + $0x38] sm:$0xff]   ;;  %s836_s27 = scalar_lea.vmem %s1135_s4, 512  ;;  %s946_s28 = smov [#allocation7]  }
  0x5c   : > { %v228_v9 = vpack.c.bf16 %v223_v8, %v222_v7  ;;  %v775_v11 = vld [vmem:[#allocation5 + $0x28] sm:$0xff]   ;;  %v220_v14 = vld [vmem:[%s1113_s9 + $0x10] sm:$0xff]  ;;  %v221_v15 = vld [vmem:[%s1113_s9 + $0x18] sm:$0xff]  ;;  %p837_p4 = scmp.ne.s32.totalorder %s1135_s4, %s836_s27  ;;  %s840_s29 = sshll.u32 %s946_s28, 4  ;;  %s841_s29 = int_to_ptr.vmem [resolvable:$false] %s840_s29 }
  0x5d   : > { %678 = vmatprep.mubr.bf16.mxu0 %v226_v6  ;;  %v224_v16 = vld [vmem:[%s1113_s9 + $0x30] sm:$0xff]  ;;  %v225_v17 = vld [vmem:[%s1113_s9 + $0x38] sm:$0xff]  ;;  %v227_v18 = vpack.c.bf16 %v221_v15, %v220_v14  ;;  %s842_s23 = scalar_lea.vmem %s841_s29, 1024  ;;  %p843_p10 = scmp.lt.s32.totalorder %s1135_s4, %s841_s29 }
  0x5e   : > { %665 = vmatpush3.bf16.msra.mxu0 %v771_v1  ;;  %695 = vmatpush3.bf16.msra.mxu1 %v771_v1  ;;  %v229_v19 = vpack.c.bf16 %v225_v17, %v224_v16  ;;  %p838_p6 = pnand %p837_p4, %p1061_p12  ;;  %p844_p13 = scmp.lt.s32.totalorder %s842_s23, %s836_s27 }
  0x5f   : > { %666 = vmatprep.subr.bf16.mxu0 %v772_v2  ;;  %688 = vmatprep.subr.bf16.mxu1 %v772_v2 }
  0x60   : > { %682 = vmatprep.mubr.bf16.mxu1 %v228_v9  ;;  %p839_p8 = pneg %p838_p6  ;;  %p845_p3 = por %p844_p13, %p843_p10 }
  0x62   : > { %667 = vmatpush3.bf16.msra.mxu0 %v772_v2  ;;  %696 = vmatpush3.bf16.msra.mxu1 %v772_v2  ;;  %p846_p7 = pnand %p845_p3, %p839_p8 }
  0x63   : > { %668 = vmatprep.subr.bf16.mxu0 %v773_v3  ;;  %689 = vmatprep.subr.bf16.mxu1 %v773_v3 }
  0x66   : > { %669 = vmatpush3.bf16.msra.mxu0 %v773_v3  ;;  %697 = vmatpush3.bf16.msra.mxu1 %v773_v3 }
  0x67   : > { %670 = vmatprep.subr.bf16.mxu0 %v774_v10  ;;  %690 = vmatprep.subr.bf16.mxu1 %v774_v10 }
  0x6a   : > { %671 = vmatpush3.bf16.msra.mxu0 %v774_v10  ;;  %698 = vmatpush3.bf16.msra.mxu1 %v774_v10 }
  0x6b   : > { %672 = vmatprep.subr.bf16.mxu0 %v775_v11  ;;  %691 = vmatprep.subr.bf16.mxu1 %v775_v11 }
  0x6e   : > { %673 = vmatpush3.bf16.msra.mxu0 %v775_v11  ;;  %699 = vmatpush3.bf16.msra.mxu1 %v775_v11 }
  0x6f   : > { %674 = vmatprep.subr.bf16.mxu0 %v776_v12  ;;  %692 = vmatprep.subr.bf16.mxu1 %v776_v12 }
  0x72   : > { %675 = vmatpush3.bf16.msra.mxu0 %v776_v12  ;;  %700 = vmatpush3.bf16.msra.mxu1 %v776_v12 }
  0x73   : > { %676 = vmatprep.subr.bf16.mxu0 %v777_v13  ;;  %693 = vmatprep.subr.bf16.mxu1 %v777_v13 }
  0x76   : > { %677 = vmatpush3.bf16.msra.mxu0 %v777_v13  ;;  %701 = vmatpush3.bf16.msra.mxu1 %v777_v13 }
  0x79   : > { %679 = vmatmul.mubr.bf16.vlgmr.msra.gmra.mrb[0].mxu0 %v227_v18  ;;  %683 = vmatmul.mubr.bf16.vlgmr.msra.gmra.mrb[0].mxu1 %v229_v19 }
 0x14c   : > { %v680_v20 = vpop.f32.mrb[0].mxu0  ;;  %v1132_v21 = vpop.f32.mrb[0].mxu1 }
 0x14d   : > { %v328_v22 = vpop.f32.mrb[1].mxu0  ;;  %v344_v23 = vpop.f32.mrb[1].mxu1  ;;  %v415_v35 = vmul.f32 %v680_v20, %v680_v20 }
 0x14e   : > { %v681_v24 = vpop.f32.mrb[2].mxu0  ;;  %v685_v25 = vpop.f32.mrb[2].mxu1  ;;  %v413_v26 = vmul.f32 %v328_v22, %v328_v22 }
 0x14f   : > { %v635_v27 = vpack.c.bf16 %v681_v24, %v680_v20  ;;  %v331_v28 = vpop.f32.mrb[3].mxu0  ;;  %v645_v29 = vpack.c.bf16 %v685_v25, %v1132_v21  ;;  %v347_v30 = vpop.f32.mrb[3].mxu1 }
 0x150   : > { %v630_v31 = vpack.c.bf16 %v331_v28, %v328_v22  ;;  %v399_v32 = vadd.f32 %v331_v28, %v328_v22  ;;  %v414_v33 = vmul.f32 %v331_v28, %v331_v28  ;;  %v640_v34 = vpack.c.bf16 %v347_v30, %v344_v23 }
 0x151   : > { %647 = vst [vmem:[%s207_s20 + $0x8] sm:$0xff] %v635_v27   ;;  %649 = vst [vmem:[%s207_s20 + $0x18] sm:$0xff] %v645_v29  }
 0x152   : > { %631 = vst [vmem:[%s207_s20] sm:$0xff] %v630_v31   ;;  %v400_v36 = vadd.f32 %v680_v20, %v399_v32  ;;  %v421_v37 = vadd.f32 %v414_v33, %v413_v26  ;;  %648 = vst [vmem:[%s207_s20 + $0x10] sm:$0xff] %v640_v34  }
 0x153   : > { %849 = shalt.err (!%p846_p7)
}
 0x154   : > { %s850_s30 = scalar_lea.hbm %s1141_s10, 512  ;;  %s854_s8 = scalar_lea.hbm %s1221_s2, 1024 }
 0x155   : > { %p851_p9 = scmp.ne.s32.totalorder %s1141_s10, %s850_s30  ;;  %p855_p5 = scmp.lt.u32.totalorder %s1141_s10, %s1221_s2 }
 0x156   : > { %p856_p11 = scmp.lt.u32.totalorder %s854_s8, %s850_s30  ;;  %p858_p4 = scmp.lt.u32.totalorder %s850_s30, %s1141_s10 }
 0x157   : > { %p852_p2 = pnand %p851_p9, %p1061_p12 }
 0x158   : > { %p857_p1 = por %p856_p11, %p855_p5 }
 0x159   : > { %p853_p0 = pneg %p852_p2 }
 0x15a   : > { %p859_p6 = por %p858_p4, %p857_p1 }
 0x15c   : > { %p860_p8 = pnand %p859_p6, %p853_p0 }
 0x15e   : > { %863 = shalt.err (!%p860_p8)
}
 0x15f   : > { %s947_s20 = smov 64   ;;  %s948_s25 = smov 4   ;;  %v416_v38 = vmul.f32 %v681_v24, %v681_v24  ;;  %v422_v39 = vadd.f32 %v421_v37, %v415_v35  ;;  %v401_v40 = vadd.f32 %v681_v24, %v400_v36  ;;  %v417_v41 = vmul.f32 %v344_v23, %v344_v23 }
 0x160   : > { %708 = dma.vmem_to_hbm [thread:$0]  (%p1061_p12), %s1135_s4, 512, %s1141_s10, %s436_s11, %s947_s20, %s947_s20, %s948_s25   ;;  %v418_v46 = vmul.f32 %v347_v30, %v347_v30  ;;  %v419_v47 = vmul.f32 %v1132_v21, %v1132_v21  ;;  %v420_v50 = vmul.f32 %v685_v25, %v685_v25 }
 0x161   : > { %v402_v42 = vadd.f32 %v401_v40, %v344_v23  ;;  %v423_v43 = vadd.f32 %v422_v39, %v416_v38  ;;  %s593_s4 = sshll.u32 %s1109_s6, 1  ;;  %s614_s26 = sshll.u32 %s991_s16, 5 }
 0x162   : > { %s214_s5 = scalar_lea.vmem [#allocation8], %s593_s4  ;;  %s1175_s28 = scalar_lea.hbm %s1222_s3, %s614_s26 }
 0x163   : > { %v424_v44 = vadd.f32 %v423_v43, %v417_v41  ;;  %v403_v45 = vadd.f32 %v402_v42, %v347_v30  ;;  %s470_s10 = sshll.u32 %s214_s5, 4  ;;  %s441_s29 = scalar_lea.sflag [#allocation9], %s1109_s6  ;;  %s1177_s10 = int_to_ptr.vmem [resolvable:$true] %s470_s10 }
 0x164   : > { %s864_s23 = scalar_lea.vmem %s1177_s10, 32  ;;  %s949_s16 = smov [#allocation8]  }
 0x165   : > { %v404_v48 = vadd.f32 %v1132_v21, %v403_v45  ;;  %v425_v49 = vadd.f32 %v424_v44, %v418_v46  ;;  %p865_p10 = scmp.ne.s32.totalorder %s1177_s10, %s864_s23  ;;  %s868_s30 = sshll.u32 %s949_s16, 4  ;;  %s869_s30 = int_to_ptr.vmem [resolvable:$false] %s868_s30 }
 0x166   : > { %s870_s22 = scalar_lea.vmem %s869_s30, 64  ;;  %p871_p7 = scmp.lt.s32.totalorder %s1177_s10, %s869_s30 }
 0x167   : > { %v405_v51 = vadd.f32 %v685_v25, %v404_v48  ;;  %v426_v52 = vadd.f32 %v425_v49, %v419_v47  ;;  %p866_p13 = pnand %p865_p10, %p1061_p12  ;;  %p872_p9 = scmp.lt.s32.totalorder %s870_s22, %s864_s23 }
 0x169   : > { %v406_v53 = vrot.slane %v405_v51, 4  ;;  %v427_v54 = vadd.f32 %v426_v52, %v420_v50  ;;  %p867_p3 = pneg %p866_p13  ;;  %p873_p2 = por %p872_p9, %p871_p7 }
 0x16b   : > { %v407_v55 = vadd.f32 %v406_v53, %v405_v51  ;;  %v428_v56 = vrot.slane %v427_v54, 4  ;;  %p874_p0 = pnand %p873_p2, %p867_p3 }
 0x16d   : > { %v408_v57 = vrot.slane %v407_v55, 2  ;;  %v429_v58 = vadd.f32 %v428_v56, %v427_v54 }
 0x16f   : > { %v409_v59 = vadd.f32 %v408_v57, %v407_v55  ;;  %v430_v60 = vrot.slane %v429_v58, 2 }
 0x171   : > { %v410_v61 = vrot.slane %v409_v59, 1  ;;  %v431_v62 = vadd.f32 %v430_v60, %v429_v58 }
 0x173   : > { %v411_v63 = vadd.f32 %v410_v61, %v409_v59  ;;  %v432_v0 = vrot.slane %v431_v62, 1 }
 0x175   : > { %412 = vst [vmem:[%s214_s5] sm:$0x1] %v411_v63  ;;  %v433_v1 = vadd.f32 %v432_v0, %v431_v62 }
 0x177   : > { %434 = vst [vmem:[%s214_s5 + $0x1] sm:$0x1] %v433_v1 }
 0x178   : > { %877 = shalt.err (!%p874_p0)
}
 0x179   : > { %s878_s6 = scalar_lea.hbm %s1175_s28, 32  ;;  %s882_s9 = scalar_lea.hbm %s1222_s3, 64 }
 0x17a   : > { %p879_p5 = scmp.ne.s32.totalorder %s1175_s28, %s878_s6  ;;  %p883_p4 = scmp.lt.u32.totalorder %s1175_s28, %s1222_s3 }
 0x17b   : > { %p884_p6 = scmp.lt.u32.totalorder %s882_s9, %s878_s6  ;;  %p886_p10 = scmp.lt.u32.totalorder %s878_s6, %s1175_s28 }
 0x17c   : > { %p880_p11 = pnand %p879_p5, %p1061_p12 }
 0x17d   : > { %p885_p8 = por %p884_p6, %p883_p4 }
 0x17e   : > { %p881_p1 = pneg %p880_p11 }
 0x17f   : > { %p887_p13 = por %p886_p10, %p885_p8 }
 0x181   : > { %p888_p3 = pnand %p887_p13, %p881_p1 }
 0x183   : > { %891 = shalt.err (!%p888_p3)
}
 0x184   : > { %709 = dma.vmem_to_hbm [thread:$0]  (%p1061_p12), %s1177_s10, 32, %s1175_s28, %s441_s29  }
 0x185 PF: > { %s482_s25 = sand.u32 1, %s926_s12   ;;  %p1237_p7 = scmp.ne.s32.totalorder %s1227_s19, 0 }
 0x186   : > { %p1238_p9 = scmp.ge.s32.totalorder %s938_s15, 2  ;;  %s483_s4 = scalar_lea.sflag [#allocation4], %s482_s25 }
 0x188   : > { %p721_p2 = pnand %p1238_p9, %p1237_p7 }
 0x18a   : > { %917 = dma.done.wait (!%p721_p2), %s483_s4, 512  }
 0x18b   : > { %919 = vsyncadd (!%p721_p2), %s483_s4, 4294966784  ;;  %s492_s26 = scalar_lea.sflag [#allocation9], %s482_s25 }
 0x18c   : > { %921 = dma.done.wait (!%p721_p2), %s492_s26, 32  }
 0x18d   : > { %923 = vsyncadd (!%p721_p2), %s492_s26, 4294967264  ;;  %p21_p12 = scmp.ge.s32.totalorder %s1026_s24, 4   ;;  %s1239_s12 = smov %s930_s13 }
 0x18e   : > { %s1240_s13 = smov %s934_s14  ;;  %s1241_s14 = smov %s1057_s17 }
 0x18f   : > { %s1242_s15 = smov %s1026_s24  ;;  %23 = sbr.rel (!%p21_p12) target bundleno = 8 (0x8), region = 94 }
 0x196   :  { %497 = vsyncpa [#allocation3], 1 }
 0x197   :  { %499 = vsyncpa [#allocation3 + $0x1], 1 }
 0x198   :  { %500 = vsyncpa [#allocation6], 1 }
 0x199   :  { %501 = vsyncpa [#allocation4], 1 }
 0x19a   :  { %503 = vsyncpa [#allocation4 + $0x1], 1 }
 0x19b   :  { %504 = vsyncpa [#allocation9], 1 }
 0x19c   :  { %506 = vsyncpa [#allocation9 + $0x1], 1 }

</bundles_post_ra>
